<compile_context>
chip_gen: v6e
topology: v6e:2x2x1
jax: 0.10.0
libtpu: 0.0.40
codegen_flags: <defaults>
</compile_context>

<pallas_src>
import functools
import math

import jax
import jax.numpy as jnp
from jax.experimental import pallas as pl
from jax.experimental.pallas import tpu as pltpu

_DEFAULT_SCALE_CLAMP = math.log(100000.0 / 16)
_LN_EPS = 1e-5


# ----------------------------------------------------------------------------
# helpers
# ----------------------------------------------------------------------------
def _layernorm(x, gamma, beta, eps=_LN_EPS):
    mu = jnp.mean(x, axis=-1, keepdims=True)
    var = jnp.mean(jnp.square(x - mu), axis=-1, keepdims=True)
    return (x - mu) * jax.lax.rsqrt(var + eps) * gamma + beta


def _vmem_limit_bytes():
    try:
        cap = int(pltpu.get_tpu_info().vmem_capacity_bytes)
    except Exception:                      # conservative fallback (v7x-safe)
        cap = 64 * 1024 * 1024
    return (cap * 7) // 8


# ----------------------------------------------------------------------------
# kernel 1: per-image multi-head self-attention + residual + norm1, fused with
#           the time MLP (SiLU -> Linear).  Gridded over images ("parallel").
# ----------------------------------------------------------------------------
def _attn_time_kernel(x_ref, wi_ref, bi_ref, wo_ref, bo_ref, g_ref, beta_ref,
                      t_ref, tw_ref, tb_ref, pro_ref, ss_ref, *, num_heads):
    C = x_ref.shape[-1]
    hd = C // num_heads
    scale = 1.0 / math.sqrt(hd)
    bf16 = jnp.bfloat16

    x = x_ref[0]                                                   # (L, C) f32
    qkv = jnp.dot(x.astype(bf16), wi_ref[...],
                  preferred_element_type=jnp.float32) + bi_ref[...]  # (L, 3C)

    heads = []
    for h in range(num_heads):            # static unroll; hd < 128 lane slices
        lo, hi = h * hd, (h + 1) * hd
        q = qkv[:, lo:hi] * scale
        k = qkv[:, C + lo:C + hi]
        v = qkv[:, 2 * C + lo:2 * C + hi]
        s = jax.lax.dot_general(q, k, (((1,), (1,)), ((), ())),
                                preferred_element_type=jnp.float32)   # (L, L)
        s = s - jnp.max(s, axis=-1, keepdims=True)
        p = jnp.exp(s)
        p = p / jnp.sum(p, axis=-1, keepdims=True)    # exact softmax (parity)
        heads.append(jnp.dot(p, v, preferred_element_type=jnp.float32))
    o = jnp.concatenate(heads, axis=-1)                            # (L, C)
    attn = jnp.dot(o.astype(bf16), wo_ref[...],
                   preferred_element_type=jnp.float32) + bo_ref[...]
    pro_ref[0] = _layernorm(x + attn, g_ref[...], beta_ref[...])

    # time conditioning for this image: SiLU -> Linear(4C, 2C)
    t = t_ref[0]                                                   # (1, 4C)
    silu = t * jax.nn.sigmoid(t)
    ss_ref[0] = jnp.dot(silu.astype(bf16), tw_ref[...],
                        preferred_element_type=jnp.float32) + tb_ref[...]


# ----------------------------------------------------------------------------
# kernel 2: dynamic_layer -> (param1, param2) as two lane-dense bf16 outputs,
#           gridded over (row tiles, column tiles), both "parallel".
# ----------------------------------------------------------------------------
def _dyn_linear_kernel(x_ref, w1_ref, b1_ref, w2_ref, b2_ref, o1_ref, o2_ref):
    xb = x_ref[...].astype(jnp.bfloat16)
    o1_ref[...] = (jnp.dot(xb, w1_ref[...], preferred_element_type=jnp.float32)
                   + b1_ref[...]).astype(o1_ref.dtype)
    o2_ref[...] = (jnp.dot(xb, w2_ref[...], preferred_element_type=jnp.float32)
                   + b2_ref[...]).astype(o2_ref.dtype)


# ----------------------------------------------------------------------------
# kernel 3: fused per-ROI chain (DynamicConv -> norm2 -> FFN -> norm3 -> FiLM
#           -> cls/reg towers -> packed heads -> apply_deltas)
# ----------------------------------------------------------------------------
def _fused_roi_kernel(pro_ref, feat_ref, p1_ref, p2_ref, boxes_ref, ss_ref,
                      dc_g1_ref, dc_b1_ref, dc_g2_ref, dc_b2_ref,
                      dcw_ref, dcb_ref, dc_g3_ref, dc_b3_ref,
                      n2g_ref, n2b_ref,
                      l1w_ref, l1b_ref, l2w_ref, l2b_ref,
                      n3g_ref, n3b_ref,
                      clsw_ref, clsg_ref, clsb_ref,
                      regw_ref, regg_ref, regb_ref,
                      hw_ref, hb_ref,
                      obj_ref, slab_ref,
                      *, num_boxes, num_images, num_classes, bbox_weights,
                      scale_clamp):
    TB, C = pro_ref.shape
    K = feat_ref.shape[1]                          # pooler_resolution ** 2
    SLAB = slab_ref.shape[-1]
    bf16 = jnp.bfloat16

    pro = pro_ref[...]                             # (TB, C) f32

    # ---- DynamicConv core: bmm -> LN -> relu -> bmm -> LN -> relu -----------
    f1 = jnp.einsum('nkc,ncd->nkd', feat_ref[...], p1_ref[...],
                    preferred_element_type=jnp.float32)            # (TB, K, dd)
    f1 = jnp.maximum(_layernorm(f1, dc_g1_ref[...], dc_b1_ref[...]), 0.0)
    f2 = jnp.einsum('nkd,ndc->nkc', f1.astype(bf16), p2_ref[...],
                    preferred_element_type=jnp.float32)            # (TB, K, C)
    f2 = jnp.maximum(_layernorm(f2, dc_g2_ref[...], dc_b2_ref[...]), 0.0)

    # out_layer as k-accumulated matmuls (== flatten(1) @ W_(K*C, C) with the
    # weight stored (K, C, C) k-major) -- no flatten scratch, no strided stores.
    acc = jnp.zeros((TB, C), jnp.float32)
    for k in range(K):                             # static unroll (K = 49)
        acc = acc + jnp.dot(f2[:, k, :].astype(bf16), dcw_ref[k],
                            preferred_element_type=jnp.float32)
    pro2 = jnp.maximum(_layernorm(acc + dcb_ref[...],
                                  dc_g3_ref[...], dc_b3_ref[...]), 0.0)

    obj = _layernorm(pro + pro2, n2g_ref[...], n2b_ref[...])       # norm2

    # ---- FFN -----------------------------------------------------------------
    h = jnp.maximum(jnp.dot(obj.astype(bf16), l1w_ref[...],
                            preferred_element_type=jnp.float32) + l1b_ref[...],
                    0.0)
    h2 = jnp.dot(h.astype(bf16), l2w_ref[...],
                 preferred_element_type=jnp.float32) + l2b_ref[...]
    obj = _layernorm(obj + h2, n3g_ref[...], n3b_ref[...])         # norm3
    obj_ref[...] = obj

    # ---- time FiLM: per-ROI (scale, shift) row select (pad rows -> identity) -
    r0 = pl.program_id(0) * TB
    row = jax.lax.broadcasted_iota(jnp.int32, (TB, 1), 0) + r0
    ss = ss_ref[...]                                               # (N, 2C)
    ssr = jnp.zeros((TB, 2 * C), jnp.float32)
    for m in range(num_images):                                    # static, tiny
        in_img = (row >= m * num_boxes) & (row < (m + 1) * num_boxes)
        ssr = jnp.where(in_img, ss[m:m + 1, :], ssr)
    fc = obj * (ssr[:, :C] + 1.0) + ssr[:, C:]

    # ---- cls / reg towers (Linear no-bias + LN + ReLU) -----------------------
    cls_feat = fc
    for j in range(clsw_ref.shape[0]):
        cls_feat = jnp.maximum(
            _layernorm(jnp.dot(cls_feat.astype(bf16), clsw_ref[j],
                               preferred_element_type=jnp.float32),
                       clsg_ref[j], clsb_ref[j]), 0.0)
    reg_feat = fc
    for j in range(regw_ref.shape[0]):
        reg_feat = jnp.maximum(
            _layernorm(jnp.dot(reg_feat.astype(bf16), regw_ref[j],
                               preferred_element_type=jnp.float32),
                       regg_ref[j], regb_ref[j]), 0.0)

    # ---- packed heads: [cls_feat | reg_feat] @ (2C, SLAB) --------------------
    headin = jnp.concatenate([cls_feat, reg_feat], axis=-1).astype(bf16)
    out = jnp.dot(headin, hw_ref[...],
                  preferred_element_type=jnp.float32) + hb_ref[...]

    # ---- apply_deltas on the delta columns, written lane-dense ---------------
    d = out[:, num_classes:num_classes + 4]
    b = boxes_ref[...]
    wx, wy, ww, wh = bbox_weights
    widths = b[:, 2:3] - b[:, 0:1]
    heights = b[:, 3:4] - b[:, 1:2]
    ctr_x = b[:, 0:1] + 0.5 * widths
    ctr_y = b[:, 1:2] + 0.5 * heights
    dx = d[:, 0:1] / wx
    dy = d[:, 1:2] / wy
    dw = jnp.minimum(d[:, 2:3] / ww, scale_clamp)
    dh = jnp.minimum(d[:, 3:4] / wh, scale_clamp)
    pcx = dx * widths + ctr_x
    pcy = dy * heights + ctr_y
    pw = jnp.exp(dw) * widths
    ph = jnp.exp(dh) * heights
    x1 = pcx - 0.5 * pw
    y1 = pcy - 0.5 * ph
    x2 = pcx + 0.5 * pw
    y2 = pcy + 0.5 * ph
    lane = jax.lax.broadcasted_iota(jnp.int32, (TB, SLAB), 1)
    slab = jnp.where(lane == num_classes, x1,
            jnp.where(lane == num_classes + 1, y1,
             jnp.where(lane == num_classes + 2, x2,
              jnp.where(lane == num_classes + 3, y2, out))))
    slab_ref[...] = slab


# ----------------------------------------------------------------------------
# parameters (deterministic synthetic init; matmul weights stored (in, out) bf16)
# ----------------------------------------------------------------------------
def init_params(key, C, dff, num_classes, dd, pr, num_cls_convs=1, num_reg_convs=3):
    keys = iter(jax.random.split(key, 64))
    bf16 = jnp.bfloat16

    def w(shape, scale=0.02, dtype=jnp.float32):
        return (jax.random.normal(next(keys), shape, jnp.float32) * scale).astype(dtype)

    zeros = lambda s: jnp.zeros(s, jnp.float32)
    ones = lambda s: jnp.ones(s, jnp.float32)
    K = pr * pr
    CD = C * dd

    p = {}
    # self-attention (+ norm1)
    p['attn_w_in'] = w((C, 3 * C), dtype=bf16);  p['attn_b_in'] = w((1, 3 * C))
    p['attn_w_out'] = w((C, C), dtype=bf16);     p['attn_b_out'] = w((1, C))
    p['norm1_g'] = ones((1, C));                 p['norm1_b'] = zeros((1, C))
    # time mlp (SiLU -> Linear(4C, 2C))
    p['time_w'] = w((4 * C, 2 * C), dtype=bf16); p['time_b'] = w((1, 2 * C))
    # DynamicConv dynamic_layer, pre-split into param1 / param2 halves
    p['dyn_w1'] = w((C, CD), dtype=bf16);        p['dyn_b1'] = w((1, CD))
    p['dyn_w2'] = w((C, CD), dtype=bf16);        p['dyn_b2'] = w((1, CD))
    p['dc_ln1_g'] = ones((1, dd));               p['dc_ln1_b'] = zeros((1, dd))
    p['dc_ln2_g'] = ones((1, C));                p['dc_ln2_b'] = zeros((1, C))
    # out_layer weight stored (K, C, C) k-major so the in-kernel k-accumulated
    # matmul is identical to flatten(1) @ W_(K*C, C).
    p['dc_out_w'] = w((K * C, C), dtype=bf16).reshape(K, C, C)
    p['dc_out_b'] = w((1, C))
    p['dc_ln3_g'] = ones((1, C));                p['dc_ln3_b'] = zeros((1, C))
    p['norm2_g'] = ones((1, C));                 p['norm2_b'] = zeros((1, C))
    # FFN
    p['lin1_w'] = w((C, dff), dtype=bf16);       p['lin1_b'] = w((1, dff))
    p['lin2_w'] = w((dff, C), dtype=bf16);       p['lin2_b'] = w((1, C))
    p['norm3_g'] = ones((1, C));                 p['norm3_b'] = zeros((1, C))
    # cls / reg towers, stacked along a leading layer axis
    p['cls_w'] = w((num_cls_convs, C, C), dtype=bf16)
    p['cls_g'] = ones((num_cls_convs, 1, C));    p['cls_b'] = zeros((num_cls_convs, 1, C))
    p['reg_w'] = w((num_reg_convs, C, C), dtype=bf16)
    p['reg_g'] = ones((num_reg_convs, 1, C));    p['reg_b'] = zeros((num_reg_convs, 1, C))
    # class_logits + bboxes_delta packed into one lane-dense (2C, SLAB) weight:
    #   rows [0:C]  -> class_logits columns [0:num_classes]
    #   rows [C:2C] -> bbox-delta columns  [num_classes:num_classes+4]
    cls_logits_w = w((C, num_classes)); cls_logits_b = w((1, num_classes))
    delta_w = w((C, 4)); delta_b = w((1, 4))
    slab = max(128, ((num_classes + 4 + 127) // 128) * 128)
    head_w = jnp.zeros((2 * C, slab), jnp.float32)
    head_w = head_w.at[:C, :num_classes].set(cls_logits_w)
    head_w = head_w.at[C:, num_classes:num_classes + 4].set(delta_w)
    head_b = jnp.zeros((1, slab), jnp.float32)
    head_b = head_b.at[:, :num_classes].set(cls_logits_b)
    head_b = head_b.at[:, num_classes:num_classes + 4].set(delta_b)
    p['head_w'] = head_w.astype(bf16)
    p['head_b'] = head_b
    return p


# ----------------------------------------------------------------------------
# forward pass (mirrors EnhancedSingleDiffusionDetHead.forward, use_lcm=False)
# ----------------------------------------------------------------------------
def enhanced_head_forward(params, features, bboxes, pro_features, pooler, time_emb,
                          num_heads=4, num_classes=80,
                          bbox_weights=(2.0, 2.0, 1.0, 1.0),
                          scale_clamp=_DEFAULT_SCALE_CLAMP, tile_nb=128):
    N, nb = bboxes.shape[:2]
    C = pro_features.shape[-1]
    NB = N * nb
    dd = params['dc_ln1_g'].shape[-1]
    CD = C * dd
    SLAB = params['head_w'].shape[-1]
    vmem_limit = _vmem_limit_bytes()

    # --- bbox2roi + pooler (external injected module; glue) ------------------
    # TODO(synk): bbox2roi + RoIAlign are external modules; the pooler contract
    # here is channel-last pooled features (NB, pr, pr, C), which removes the
    # (NB,C,K)->(NB,K,C) HBM transpose pass entirely.
    batch_idx = jnp.repeat(jnp.arange(N, dtype=jnp.float32), nb)[:, None]
    rois = jnp.concatenate([batch_idx, bboxes.reshape(NB, 4).astype(jnp.float32)],
                           axis=1)
    roi_features = pooler(features, rois)              # (NB, pr, pr, C)
    pr_ = roi_features.shape[1]
    K = pr_ * pr_

    # --- K1: per-image self-attention + norm1 + time MLP ---------------------
    x3 = pro_features.astype(jnp.float32)              # (N, nb, C)
    t3 = time_emb.astype(jnp.float32).reshape(N, 1, 4 * C)
    pro3, ss3 = pl.pallas_call(
        functools.partial(_attn_time_kernel, num_heads=num_heads),
        out_shape=(jax.ShapeDtypeStruct((N, nb, C), jnp.float32),
                   jax.ShapeDtypeStruct((N, 1, 2 * C), jnp.float32)),
        grid_spec=pltpu.PrefetchScalarGridSpec(
            num_scalar_prefetch=0,
            grid=(N,),
            in_specs=[pl.BlockSpec((1, nb, C), lambda n: (n, 0, 0)),
                      pl.BlockSpec((C, 3 * C), lambda n: (0, 0)),
                      pl.BlockSpec((1, 3 * C), lambda n: (0, 0)),
                      pl.BlockSpec((C, C), lambda n: (0, 0)),
                      pl.BlockSpec((1, C), lambda n: (0, 0)),
                      pl.BlockSpec((1, C), lambda n: (0, 0)),
                      pl.BlockSpec((1, C), lambda n: (0, 0)),
                      pl.BlockSpec((1, 1, 4 * C), lambda n: (n, 0, 0)),
                      pl.BlockSpec((4 * C, 2 * C), lambda n: (0, 0)),
                      pl.BlockSpec((1, 2 * C), lambda n: (0, 0))],
            out_specs=[pl.BlockSpec((1, nb, C), lambda n: (n, 0, 0)),
                       pl.BlockSpec((1, 1, 2 * C), lambda n: (n, 0, 0))]),
        compiler_params=pltpu.CompilerParams(
            dimension_semantics=("parallel",), vmem_limit_bytes=vmem_limit),
    )(x3, params['attn_w_in'], params['attn_b_in'], params['attn_w_out'],
      params['attn_b_out'], params['norm1_g'], params['norm1_b'],
      t3, params['time_w'], params['time_b'])
    ss = ss3.reshape(N, 2 * C)

    # --- pad ROI rows up to a multiple of TB (row-wise ops -> zero pad safe) --
    TB = int(tile_nb)
    NB_pad = ((NB + TB - 1) // TB) * TB
    pad = NB_pad - NB
    grid_rows = NB_pad // TB

    pro_p = jnp.pad(pro3.reshape(NB, C), ((0, pad), (0, 0)))
    feat_p = jnp.pad(roi_features.reshape(NB, K, C).astype(jnp.bfloat16),
                     ((0, pad), (0, 0), (0, 0)))
    boxes_p = jnp.pad(bboxes.reshape(NB, 4).astype(jnp.float32), ((0, pad), (0, 0)))

    # --- K2: dynamic_layer -> (param1, param2), bf16, row x column grid -------
    TN = math.gcd(CD, 4096)
    p1f, p2f = pl.pallas_call(
        _dyn_linear_kernel,
        out_shape=(jax.ShapeDtypeStruct((NB_pad, CD), jnp.bfloat16),
                   jax.ShapeDtypeStruct((NB_pad, CD), jnp.bfloat16)),
        grid_spec=pltpu.PrefetchScalarGridSpec(
            num_scalar_prefetch=0,
            grid=(grid_rows, CD // TN),
            in_specs=[pl.BlockSpec((TB, C), lambda i, j: (i, 0)),
                      pl.BlockSpec((C, TN), lambda i, j: (0, j)),
                      pl.BlockSpec((1, TN), lambda i, j: (0, j)),
                      pl.BlockSpec((C, TN), lambda i, j: (0, j)),
                      pl.BlockSpec((1, TN), lambda i, j: (0, j))],
            out_specs=[pl.BlockSpec((TB, TN), lambda i, j: (i, j)),
                       pl.BlockSpec((TB, TN), lambda i, j: (i, j))]),
        compiler_params=pltpu.CompilerParams(
            dimension_semantics=("parallel", "parallel"),
            vmem_limit_bytes=vmem_limit),
    )(pro_p, params['dyn_w1'], params['dyn_b1'],
      params['dyn_w2'], params['dyn_b2'])
    # layout-preserving (free) reshapes: no slice copy, since param1/param2 are
    # separate lane-dense outputs.
    p1 = p1f.reshape(NB_pad, C, dd)
    p2 = p2f.reshape(NB_pad, dd, C)

    # --- K3: fused per-ROI chain ----------------------------------------------
    def _rows(a):
        nd = a.ndim
        return pl.BlockSpec((TB,) + tuple(a.shape[1:]),
                            lambda i, _nd=nd: (i,) + (0,) * (_nd - 1))

    def _full(a):
        nd = a.ndim
        return pl.BlockSpec(tuple(a.shape), lambda i, _nd=nd: (0,) * _nd)

    tiled = [pro_p, feat_p, p1, p2, boxes_p]
    shared = [ss,
              params['dc_ln1_g'], params['dc_ln1_b'],
              params['dc_ln2_g'], params['dc_ln2_b'],
              params['dc_out_w'], params['dc_out_b'],
              params['dc_ln3_g'], params['dc_ln3_b'],
              params['norm2_g'], params['norm2_b'],
              params['lin1_w'], params['lin1_b'],
              params['lin2_w'], params['lin2_b'],
              params['norm3_g'], params['norm3_b'],
              params['cls_w'], params['cls_g'], params['cls_b'],
              params['reg_w'], params['reg_g'], params['reg_b'],
              params['head_w'], params['head_b']]
    in_specs = [_rows(a) for a in tiled] + [_full(a) for a in shared]
    # NOTE: at production shapes the large invariant weights (dc_out_w, lin1_w,
    # lin2_w, head_w) would ideally be single-buffered (pipeline_mode=
    # pl.Buffered(1)) to recover VMEM on v7x; left at the default for lowering
    # safety, their constant index_map already avoids re-fetching.

    dff = params['lin1_w'].shape[1]
    n_tower = int(params['cls_w'].shape[0] + params['reg_w'].shape[0])
    flops = NB_pad * (4 * K * C * dd + 2 * K * C * C + 4 * C * dff
                      + 2 * C * C * n_tower + 4 * C * SLAB)
    bytes_accessed = (2 * (feat_p.size + p1.size + p2.size)        # bf16 streams
                      + 4 * (pro_p.size + boxes_p.size + NB_pad * (C + SLAB))
                      + sum(int(a.size) * a.dtype.itemsize for a in shared))
    cost = pl.CostEstimate(flops=int(flops), transcendentals=int(NB_pad * 8),
                           bytes_accessed=int(bytes_accessed))

    obj_flat, slab = pl.pallas_call(
        functools.partial(_fused_roi_kernel, num_boxes=nb, num_images=N,
                          num_classes=num_classes, bbox_weights=bbox_weights,
                          scale_clamp=scale_clamp),
        out_shape=(jax.ShapeDtypeStruct((NB_pad, C), jnp.float32),
                   jax.ShapeDtypeStruct((NB_pad, SLAB), jnp.float32)),
        grid_spec=pltpu.PrefetchScalarGridSpec(
            num_scalar_prefetch=0,
            grid=(grid_rows,),
            in_specs=in_specs,
            out_specs=[pl.BlockSpec((TB, C), lambda i: (i, 0)),
                       pl.BlockSpec((TB, SLAB), lambda i: (i, 0))]),
        compiler_params=pltpu.CompilerParams(
            dimension_semantics=("parallel",), vmem_limit_bytes=vmem_limit),
        cost_estimate=cost,
    )(*(tiled + shared))

    class_logits = slab[:NB, :num_classes].reshape(N, nb, num_classes)
    pred_bboxes = slab[:NB, num_classes:num_classes + 4].reshape(N, nb, 4)
    obj_features = obj_flat[:NB].reshape(1, NB, C)
    # use_lcm=False (module default): lcm_feature_enhance branch not exercised.
    return class_logits, pred_bboxes, obj_features


# ----------------------------------------------------------------------------
# main
# ----------------------------------------------------------------------------
if __name__ == "__main__":
    key = jax.random.PRNGKey(0)
    N, nb = 2, 8
    C, heads, dff, dd, pr, ncls = 64, 4, 128, 32, 7, 10

    k1, k2, k3, k4, k5, k6 = jax.random.split(key, 6)
    features = jax.random.normal(k1, (N, C, 16, 16), jnp.float32)   # backbone map
    xy = jax.random.uniform(k2, (N, nb, 2), minval=0.0, maxval=50.0)
    wh_ = jax.random.uniform(k3, (N, nb, 2), minval=4.0, maxval=40.0)
    bboxes = jnp.concatenate([xy, xy + wh_], axis=-1)               # (N, nb, 4)
    pro_features = jax.random.normal(k4, (N, nb, C), jnp.float32)
    time_emb = jax.random.normal(k5, (N, 4 * C), jnp.float32)

    # TODO(synk): bbox2roi + RoIAlign pooler are external injected modules;
    # replaced with a deterministic stub returning channel-last pooled feats.
    roi_stub = jax.random.normal(k6, (N * nb, pr, pr, C),
                                 jnp.float32).astype(jnp.bfloat16)
    pooler = lambda feats, rois: roi_stub

    params = init_params(jax.random.fold_in(key, 7), C, dff, ncls, dd, pr)

    logits, pred_boxes, obj_feats = enhanced_head_forward(
        params, features, bboxes, pro_features, pooler, time_emb,
        num_heads=heads, num_classes=ncls)
    jax.block_until_ready((logits, pred_boxes, obj_feats))

    assert logits.shape == (N, nb, ncls)
    assert pred_boxes.shape == (N, nb, 4)
    assert obj_feats.shape == (1, N * nb, C)
    assert bool(jnp.all(jnp.isfinite(logits)))
    assert bool(jnp.all(jnp.isfinite(pred_boxes)))
    assert bool(jnp.all(jnp.isfinite(obj_feats)))
    print("KERNEL_OK")
</pallas_src>

<mosaic_0001>
module attributes {stable_mosaic.version = 11 : i64} {
  func.func @_attn_time_kernel(%arg0: i32, %arg1: memref<1x8x64xf32, #tpu.memory_space<vmem>>, %arg2: memref<64x192xbf16, #tpu.memory_space<vmem>>, %arg3: memref<1x192xf32, #tpu.memory_space<vmem>>, %arg4: memref<64x64xbf16, #tpu.memory_space<vmem>>, %arg5: memref<1x64xf32, #tpu.memory_space<vmem>>, %arg6: memref<1x64xf32, #tpu.memory_space<vmem>>, %arg7: memref<1x64xf32, #tpu.memory_space<vmem>>, %arg8: memref<1x1x256xf32, #tpu.memory_space<vmem>>, %arg9: memref<256x128xbf16, #tpu.memory_space<vmem>>, %arg10: memref<1x128xf32, #tpu.memory_space<vmem>>, %arg11: memref<1x8x64xf32, #tpu.memory_space<vmem>>, %arg12: memref<1x1x128xf32, #tpu.memory_space<vmem>>) attributes {dimension_semantics = [#tpu.dimension_semantics<parallel>], iteration_bounds = array<i64: 2>, scalar_prefetch = 0 : i64, scratch_operands = 0 : i64, tpu.core_type = #tpu.core_type<tc>, window_params = [{transform_indices = @transform_0, window_bounds = array<i64: 1, 8, 64>}, {pipeline_mode = #tpu.pipeline_mode<synchronous>, transform_indices = @transform_1, window_bounds = array<i64: 64, 192>}, {pipeline_mode = #tpu.pipeline_mode<synchronous>, transform_indices = @transform_2, window_bounds = array<i64: 1, 192>}, {pipeline_mode = #tpu.pipeline_mode<synchronous>, transform_indices = @transform_3, window_bounds = array<i64: 64, 64>}, {pipeline_mode = #tpu.pipeline_mode<synchronous>, transform_indices = @transform_4, window_bounds = array<i64: 1, 64>}, {pipeline_mode = #tpu.pipeline_mode<synchronous>, transform_indices = @transform_5, window_bounds = array<i64: 1, 64>}, {pipeline_mode = #tpu.pipeline_mode<synchronous>, transform_indices = @transform_6, window_bounds = array<i64: 1, 64>}, {transform_indices = @transform_7, window_bounds = array<i64: 1, 1, 256>}, {pipeline_mode = #tpu.pipeline_mode<synchronous>, transform_indices = @transform_8, window_bounds = array<i64: 256, 128>}, {pipeline_mode = #tpu.pipeline_mode<synchronous>, transform_indices = @transform_9, window_bounds = array<i64: 1, 128>}, {transform_indices = @transform_10, window_bounds = array<i64: 1, 8, 64>}, {transform_indices = @transform_11, window_bounds = array<i64: 1, 1, 128>}]} {
    %c0 = arith.constant 0 : index
    %c0_0 = arith.constant 0 : index
    %c0_1 = arith.constant 0 : index
    %0 = vector.load %arg1[%c0, %c0_0, %c0_1] : memref<1x8x64xf32, #tpu.memory_space<vmem>>, vector<1x8x64xf32>
    %1 = vector.shape_cast %0 : vector<1x8x64xf32> to vector<8x64xf32>
    %2 = arith.truncf %1 : vector<8x64xf32> to vector<8x64xbf16>
    %c0_2 = arith.constant 0 : index
    %c0_3 = arith.constant 0 : index
    %3 = vector.load %arg2[%c0_2, %c0_3] : memref<64x192xbf16, #tpu.memory_space<vmem>>, vector<64x192xbf16>
    %cst = arith.constant dense<0.000000e+00> : vector<8x192xf32>
    %4 = tpu.matmul %2, %3, %cst {dimension_numbers = #tpu.dot_dimension_numbers<[1], [0], [0], [1], [0, 0, 1, 1], [], []>} : vector<8x64xbf16>, vector<64x192xbf16>, vector<8x192xf32> -> vector<8x192xf32>
    %c0_4 = arith.constant 0 : index
    %c0_5 = arith.constant 0 : index
    %5 = vector.load %arg3[%c0_4, %c0_5] : memref<1x192xf32, #tpu.memory_space<vmem>>, vector<1x192xf32>
    %6 = vector.broadcast %5 : vector<1x192xf32> to vector<8x192xf32>
    %7 = arith.addf %4, %6 : vector<8x192xf32>
    %8 = vector.extract_strided_slice %7 {offsets = [0, 0], sizes = [8, 16], strides = [1, 1]} : vector<8x192xf32> to vector<8x16xf32>
    %cst_6 = arith.constant 2.500000e-01 : f32
    %9 = vector.broadcast %cst_6 : f32 to vector<8x16xf32>
    %10 = arith.mulf %8, %9 : vector<8x16xf32>
    %11 = vector.extract_strided_slice %7 {offsets = [0, 64], sizes = [8, 16], strides = [1, 1]} : vector<8x192xf32> to vector<8x16xf32>
    %12 = vector.extract_strided_slice %7 {offsets = [0, 128], sizes = [8, 16], strides = [1, 1]} : vector<8x192xf32> to vector<8x16xf32>
    %cst_7 = arith.constant dense<0.000000e+00> : vector<8x8xf32>
    %13 = tpu.matmul %10, %11, %cst_7 {dimension_numbers = #tpu.dot_dimension_numbers<[1], [1], [0], [0], [0, 0, 1, 0], [], []>} : vector<8x16xf32>, vector<8x16xf32>, vector<8x8xf32> -> vector<8x8xf32>
    %cst_8 = arith.constant dense<0xFF800000> : vector<8xf32>
    %14 = vector.multi_reduction <maximumf>, %13, %cst_8 [1] : vector<8x8xf32> to vector<8xf32>
    %15 = vector.shape_cast %14 : vector<8xf32> to vector<8x1xf32>
    %16 = vector.broadcast %15 : vector<8x1xf32> to vector<8x8xf32>
    %17 = arith.subf %13, %16 : vector<8x8xf32>
    %18 = math.exp %17 : vector<8x8xf32>
    %cst_9 = arith.constant dense<0.000000e+00> : vector<8xf32>
    %19 = vector.multi_reduction <add>, %18, %cst_9 [1] : vector<8x8xf32> to vector<8xf32>
    %20 = vector.shape_cast %19 : vector<8xf32> to vector<8x1xf32>
    %21 = vector.broadcast %20 : vector<8x1xf32> to vector<8x8xf32>
    %22 = arith.divf %18, %21 : vector<8x8xf32>
    %cst_10 = arith.constant dense<0.000000e+00> : vector<8x16xf32>
    %23 = tpu.matmul %22, %12, %cst_10 {dimension_numbers = #tpu.dot_dimension_numbers<[1], [0], [0], [1], [0, 0, 1, 1], [], []>} : vector<8x8xf32>, vector<8x16xf32>, vector<8x16xf32> -> vector<8x16xf32>
    %24 = vector.extract_strided_slice %7 {offsets = [0, 16], sizes = [8, 16], strides = [1, 1]} : vector<8x192xf32> to vector<8x16xf32>
    %cst_11 = arith.constant 2.500000e-01 : f32
    %25 = vector.broadcast %cst_11 : f32 to vector<8x16xf32>
    %26 = arith.mulf %24, %25 : vector<8x16xf32>
    %27 = vector.extract_strided_slice %7 {offsets = [0, 80], sizes = [8, 16], strides = [1, 1]} : vector<8x192xf32> to vector<8x16xf32>
    %28 = vector.extract_strided_slice %7 {offsets = [0, 144], sizes = [8, 16], strides = [1, 1]} : vector<8x192xf32> to vector<8x16xf32>
    %cst_12 = arith.constant dense<0.000000e+00> : vector<8x8xf32>
    %29 = tpu.matmul %26, %27, %cst_12 {dimension_numbers = #tpu.dot_dimension_numbers<[1], [1], [0], [0], [0, 0, 1, 0], [], []>} : vector<8x16xf32>, vector<8x16xf32>, vector<8x8xf32> -> vector<8x8xf32>
    %cst_13 = arith.constant dense<0xFF800000> : vector<8xf32>
    %30 = vector.multi_reduction <maximumf>, %29, %cst_13 [1] : vector<8x8xf32> to vector<8xf32>
    %31 = vector.shape_cast %30 : vector<8xf32> to vector<8x1xf32>
    %32 = vector.broadcast %31 : vector<8x1xf32> to vector<8x8xf32>
    %33 = arith.subf %29, %32 : vector<8x8xf32>
    %34 = math.exp %33 : vector<8x8xf32>
    %cst_14 = arith.constant dense<0.000000e+00> : vector<8xf32>
    %35 = vector.multi_reduction <add>, %34, %cst_14 [1] : vector<8x8xf32> to vector<8xf32>
    %36 = vector.shape_cast %35 : vector<8xf32> to vector<8x1xf32>
    %37 = vector.broadcast %36 : vector<8x1xf32> to vector<8x8xf32>
    %38 = arith.divf %34, %37 : vector<8x8xf32>
    %cst_15 = arith.constant dense<0.000000e+00> : vector<8x16xf32>
    %39 = tpu.matmul %38, %28, %cst_15 {dimension_numbers = #tpu.dot_dimension_numbers<[1], [0], [0], [1], [0, 0, 1, 1], [], []>} : vector<8x8xf32>, vector<8x16xf32>, vector<8x16xf32> -> vector<8x16xf32>
    %40 = vector.extract_strided_slice %7 {offsets = [0, 32], sizes = [8, 16], strides = [1, 1]} : vector<8x192xf32> to vector<8x16xf32>
    %cst_16 = arith.constant 2.500000e-01 : f32
    %41 = vector.broadcast %cst_16 : f32 to vector<8x16xf32>
    %42 = arith.mulf %40, %41 : vector<8x16xf32>
    %43 = vector.extract_strided_slice %7 {offsets = [0, 96], sizes = [8, 16], strides = [1, 1]} : vector<8x192xf32> to vector<8x16xf32>
    %44 = vector.extract_strided_slice %7 {offsets = [0, 160], sizes = [8, 16], strides = [1, 1]} : vector<8x192xf32> to vector<8x16xf32>
    %cst_17 = arith.constant dense<0.000000e+00> : vector<8x8xf32>
    %45 = tpu.matmul %42, %43, %cst_17 {dimension_numbers = #tpu.dot_dimension_numbers<[1], [1], [0], [0], [0, 0, 1, 0], [], []>} : vector<8x16xf32>, vector<8x16xf32>, vector<8x8xf32> -> vector<8x8xf32>
    %cst_18 = arith.constant dense<0xFF800000> : vector<8xf32>
    %46 = vector.multi_reduction <maximumf>, %45, %cst_18 [1] : vector<8x8xf32> to vector<8xf32>
    %47 = vector.shape_cast %46 : vector<8xf32> to vector<8x1xf32>
    %48 = vector.broadcast %47 : vector<8x1xf32> to vector<8x8xf32>
    %49 = arith.subf %45, %48 : vector<8x8xf32>
    %50 = math.exp %49 : vector<8x8xf32>
    %cst_19 = arith.constant dense<0.000000e+00> : vector<8xf32>
    %51 = vector.multi_reduction <add>, %50, %cst_19 [1] : vector<8x8xf32> to vector<8xf32>
    %52 = vector.shape_cast %51 : vector<8xf32> to vector<8x1xf32>
    %53 = vector.broadcast %52 : vector<8x1xf32> to vector<8x8xf32>
    %54 = arith.divf %50, %53 : vector<8x8xf32>
    %cst_20 = arith.constant dense<0.000000e+00> : vector<8x16xf32>
    %55 = tpu.matmul %54, %44, %cst_20 {dimension_numbers = #tpu.dot_dimension_numbers<[1], [0], [0], [1], [0, 0, 1, 1], [], []>} : vector<8x8xf32>, vector<8x16xf32>, vector<8x16xf32> -> vector<8x16xf32>
    %56 = vector.extract_strided_slice %7 {offsets = [0, 48], sizes = [8, 16], strides = [1, 1]} : vector<8x192xf32> to vector<8x16xf32>
    %cst_21 = arith.constant 2.500000e-01 : f32
    %57 = vector.broadcast %cst_21 : f32 to vector<8x16xf32>
    %58 = arith.mulf %56, %57 : vector<8x16xf32>
    %59 = vector.extract_strided_slice %7 {offsets = [0, 112], sizes = [8, 16], strides = [1, 1]} : vector<8x192xf32> to vector<8x16xf32>
    %60 = vector.extract_strided_slice %7 {offsets = [0, 176], sizes = [8, 16], strides = [1, 1]} : vector<8x192xf32> to vector<8x16xf32>
    %cst_22 = arith.constant dense<0.000000e+00> : vector<8x8xf32>
    %61 = tpu.matmul %58, %59, %cst_22 {dimension_numbers = #tpu.dot_dimension_numbers<[1], [1], [0], [0], [0, 0, 1, 0], [], []>} : vector<8x16xf32>, vector<8x16xf32>, vector<8x8xf32> -> vector<8x8xf32>
    %cst_23 = arith.constant dense<0xFF800000> : vector<8xf32>
    %62 = vector.multi_reduction <maximumf>, %61, %cst_23 [1] : vector<8x8xf32> to vector<8xf32>
    %63 = vector.shape_cast %62 : vector<8xf32> to vector<8x1xf32>
    %64 = vector.broadcast %63 : vector<8x1xf32> to vector<8x8xf32>
    %65 = arith.subf %61, %64 : vector<8x8xf32>
    %66 = math.exp %65 : vector<8x8xf32>
    %cst_24 = arith.constant dense<0.000000e+00> : vector<8xf32>
    %67 = vector.multi_reduction <add>, %66, %cst_24 [1] : vector<8x8xf32> to vector<8xf32>
    %68 = vector.shape_cast %67 : vector<8xf32> to vector<8x1xf32>
    %69 = vector.broadcast %68 : vector<8x1xf32> to vector<8x8xf32>
    %70 = arith.divf %66, %69 : vector<8x8xf32>
    %cst_25 = arith.constant dense<0.000000e+00> : vector<8x16xf32>
    %71 = tpu.matmul %70, %60, %cst_25 {dimension_numbers = #tpu.dot_dimension_numbers<[1], [0], [0], [1], [0, 0, 1, 1], [], []>} : vector<8x8xf32>, vector<8x16xf32>, vector<8x16xf32> -> vector<8x16xf32>
    %72 = tpu.concatenate %23, %39, %55, %71 in 1 : vector<8x16xf32>, vector<8x16xf32>, vector<8x16xf32>, vector<8x16xf32> -> vector<8x64xf32>
    %73 = arith.truncf %72 : vector<8x64xf32> to vector<8x64xbf16>
    %c0_26 = arith.constant 0 : index
    %c0_27 = arith.constant 0 : index
    %74 = vector.load %arg4[%c0_26, %c0_27] : memref<64x64xbf16, #tpu.memory_space<vmem>>, vector<64x64xbf16>
    %cst_28 = arith.constant dense<0.000000e+00> : vector<8x64xf32>
    %75 = tpu.matmul %73, %74, %cst_28 {dimension_numbers = #tpu.dot_dimension_numbers<[1], [0], [0], [1], [0, 0, 1, 1], [], []>} : vector<8x64xbf16>, vector<64x64xbf16>, vector<8x64xf32> -> vector<8x64xf32>
    %c0_29 = arith.constant 0 : index
    %c0_30 = arith.constant 0 : index
    %76 = vector.load %arg5[%c0_29, %c0_30] : memref<1x64xf32, #tpu.memory_space<vmem>>, vector<1x64xf32>
    %77 = vector.broadcast %76 : vector<1x64xf32> to vector<8x64xf32>
    %78 = arith.addf %75, %77 : vector<8x64xf32>
    %79 = arith.addf %1, %78 : vector<8x64xf32>
    %c0_31 = arith.constant 0 : index
    %c0_32 = arith.constant 0 : index
    %80 = vector.load %arg6[%c0_31, %c0_32] : memref<1x64xf32, #tpu.memory_space<vmem>>, vector<1x64xf32>
    %c0_33 = arith.constant 0 : index
    %c0_34 = arith.constant 0 : index
    %81 = vector.load %arg7[%c0_33, %c0_34] : memref<1x64xf32, #tpu.memory_space<vmem>>, vector<1x64xf32>
    %cst_35 = arith.constant dense<0.000000e+00> : vector<8xf32>
    %82 = vector.multi_reduction <add>, %79, %cst_35 [1] : vector<8x64xf32> to vector<8xf32>
    %83 = vector.shape_cast %82 : vector<8xf32> to vector<8x1xf32>
    %cst_36 = arith.constant 6.400000e+01 : f32
    %84 = vector.broadcast %cst_36 : f32 to vector<8x1xf32>
    %85 = arith.divf %83, %84 : vector<8x1xf32>
    %86 = vector.broadcast %85 : vector<8x1xf32> to vector<8x64xf32>
    %87 = arith.subf %79, %86 : vector<8x64xf32>
    %88 = arith.mulf %87, %87 : vector<8x64xf32>
    %cst_37 = arith.constant dense<0.000000e+00> : vector<8xf32>
    %89 = vector.multi_reduction <add>, %88, %cst_37 [1] : vector<8x64xf32> to vector<8xf32>
    %90 = vector.shape_cast %89 : vector<8xf32> to vector<8x1xf32>
    %cst_38 = arith.constant 6.400000e+01 : f32
    %91 = vector.broadcast %cst_38 : f32 to vector<8x1xf32>
    %92 = arith.divf %90, %91 : vector<8x1xf32>
    %93 = vector.broadcast %85 : vector<8x1xf32> to vector<8x64xf32>
    %94 = arith.subf %79, %93 : vector<8x64xf32>
    %cst_39 = arith.constant 9.99999974E-6 : f32
    %95 = vector.broadcast %cst_39 : f32 to vector<8x1xf32>
    %96 = arith.addf %92, %95 : vector<8x1xf32>
    %97 = math.rsqrt %96 : vector<8x1xf32>
    %98 = vector.broadcast %97 : vector<8x1xf32> to vector<8x64xf32>
    %99 = arith.mulf %94, %98 : vector<8x64xf32>
    %100 = vector.broadcast %80 : vector<1x64xf32> to vector<8x64xf32>
    %101 = arith.mulf %99, %100 : vector<8x64xf32>
    %102 = vector.broadcast %81 : vector<1x64xf32> to vector<8x64xf32>
    %103 = arith.addf %101, %102 : vector<8x64xf32>
    %c0_40 = arith.constant 0 : index
    %c0_41 = arith.constant 0 : index
    %c0_42 = arith.constant 0 : index
    %104 = vector.load %arg11[%c0_40, %c0_41, %c0_42] : memref<1x8x64xf32, #tpu.memory_space<vmem>>, vector<1x8x64xf32>
    %105 = vector.shape_cast %104 : vector<1x8x64xf32> to vector<8x64xf32>
    %106 = vector.shape_cast %103 : vector<8x64xf32> to vector<1x8x64xf32>
    tpu.vector_store %arg11[%c0_40, %c0_41, %c0_42], %106 {strides = array<i32>} : memref<1x8x64xf32, #tpu.memory_space<vmem>>, vector<1x8x64xf32>,
    %c0_43 = arith.constant 0 : index
    %c0_44 = arith.constant 0 : index
    %c0_45 = arith.constant 0 : index
    %107 = vector.load %arg8[%c0_43, %c0_44, %c0_45] : memref<1x1x256xf32, #tpu.memory_space<vmem>>, vector<1x1x256xf32>
    %108 = vector.shape_cast %107 : vector<1x1x256xf32> to vector<1x256xf32>
    %109 = arith.negf %108 : vector<1x256xf32>
    %110 = math.exp %109 : vector<1x256xf32>
    %cst_46 = arith.constant 1.000000e+00 : f32
    %111 = vector.broadcast %cst_46 : f32 to vector<1x256xf32>
    %112 = arith.addf %111, %110 : vector<1x256xf32>
    %113 = arith.divf %111, %112 : vector<1x256xf32>
    %114 = arith.mulf %108, %113 : vector<1x256xf32>
    %115 = arith.truncf %114 : vector<1x256xf32> to vector<1x256xbf16>
    %c0_47 = arith.constant 0 : index
    %c0_48 = arith.constant 0 : index
    %116 = vector.load %arg9[%c0_47, %c0_48] : memref<256x128xbf16, #tpu.memory_space<vmem>>, vector<256x128xbf16>
    %cst_49 = arith.constant dense<0.000000e+00> : vector<1x128xf32>
    %117 = tpu.matmul %115, %116, %cst_49 {dimension_numbers = #tpu.dot_dimension_numbers<[1], [0], [0], [1], [0, 0, 1, 1], [], []>} : vector<1x256xbf16>, vector<256x128xbf16>, vector<1x128xf32> -> vector<1x128xf32>
    %c0_50 = arith.constant 0 : index
    %c0_51 = arith.constant 0 : index
    %118 = vector.load %arg10[%c0_50, %c0_51] : memref<1x128xf32, #tpu.memory_space<vmem>>, vector<1x128xf32>
    %119 = arith.addf %117, %118 : vector<1x128xf32>
    %c0_52 = arith.constant 0 : index
    %c0_53 = arith.constant 0 : index
    %c0_54 = arith.constant 0 : index
    %120 = vector.load %arg12[%c0_52, %c0_53, %c0_54] : memref<1x1x128xf32, #tpu.memory_space<vmem>>, vector<1x1x128xf32>
    %121 = vector.shape_cast %120 : vector<1x1x128xf32> to vector<1x128xf32>
    %122 = vector.shape_cast %119 : vector<1x128xf32> to vector<1x1x128xf32>
    tpu.vector_store %arg12[%c0_52, %c0_53, %c0_54], %122 {strides = array<i32>} : memref<1x1x128xf32, #tpu.memory_space<vmem>>, vector<1x1x128xf32>,
    return
  }
  func.func @transform_0(%arg0: i32) -> (i32, i32, i32) {
    %c0_i32 = arith.constant 0 : i32
    %c0_i32_0 = arith.constant 0 : i32
    %c0_i32_1 = arith.constant 0 : i32
    return %arg0, %c0_i32, %c0_i32_0 : i32, i32, i32
  }
  func.func @transform_1(%arg0: i32) -> (i32, i32) {
    %c0_i32 = arith.constant 0 : i32
    %c0_i32_0 = arith.constant 0 : i32
    %c0_i32_1 = arith.constant 0 : i32
    return %c0_i32, %c0_i32_0 : i32, i32
  }
  func.func @transform_2(%arg0: i32) -> (i32, i32) {
    %c0_i32 = arith.constant 0 : i32
    %c0_i32_0 = arith.constant 0 : i32
    %c0_i32_1 = arith.constant 0 : i32
    return %c0_i32, %c0_i32_0 : i32, i32
  }
  func.func @transform_3(%arg0: i32) -> (i32, i32) {
    %c0_i32 = arith.constant 0 : i32
    %c0_i32_0 = arith.constant 0 : i32
    %c0_i32_1 = arith.constant 0 : i32
    return %c0_i32, %c0_i32_0 : i32, i32
  }
  func.func @transform_4(%arg0: i32) -> (i32, i32) {
    %c0_i32 = arith.constant 0 : i32
    %c0_i32_0 = arith.constant 0 : i32
    %c0_i32_1 = arith.constant 0 : i32
    return %c0_i32, %c0_i32_0 : i32, i32
  }
  func.func @transform_5(%arg0: i32) -> (i32, i32) {
    %c0_i32 = arith.constant 0 : i32
    %c0_i32_0 = arith.constant 0 : i32
    %c0_i32_1 = arith.constant 0 : i32
    return %c0_i32, %c0_i32_0 : i32, i32
  }
  func.func @transform_6(%arg0: i32) -> (i32, i32) {
    %c0_i32 = arith.constant 0 : i32
    %c0_i32_0 = arith.constant 0 : i32
    %c0_i32_1 = arith.constant 0 : i32
    return %c0_i32, %c0_i32_0 : i32, i32
  }
  func.func @transform_7(%arg0: i32) -> (i32, i32, i32) {
    %c0_i32 = arith.constant 0 : i32
    %c0_i32_0 = arith.constant 0 : i32
    %c0_i32_1 = arith.constant 0 : i32
    return %arg0, %c0_i32, %c0_i32_0 : i32, i32, i32
  }
  func.func @transform_8(%arg0: i32) -> (i32, i32) {
    %c0_i32 = arith.constant 0 : i32
    %c0_i32_0 = arith.constant 0 : i32
    %c0_i32_1 = arith.constant 0 : i32
    return %c0_i32, %c0_i32_0 : i32, i32
  }
  func.func @transform_9(%arg0: i32) -> (i32, i32) {
    %c0_i32 = arith.constant 0 : i32
    %c0_i32_0 = arith.constant 0 : i32
    %c0_i32_1 = arith.constant 0 : i32
    return %c0_i32, %c0_i32_0 : i32, i32
  }
  func.func @transform_10(%arg0: i32) -> (i32, i32, i32) {
    %c0_i32 = arith.constant 0 : i32
    %c0_i32_0 = arith.constant 0 : i32
    %c0_i32_1 = arith.constant 0 : i32
    return %arg0, %c0_i32, %c0_i32_0 : i32, i32, i32
  }
  func.func @transform_11(%arg0: i32) -> (i32, i32, i32) {
    %c0_i32 = arith.constant 0 : i32
    %c0_i32_0 = arith.constant 0 : i32
    %c0_i32_1 = arith.constant 0 : i32
    return %arg0, %c0_i32, %c0_i32_0 : i32, i32, i32
  }
}

</mosaic_0001>

<bundles_post_ra>
// kernel: tpu_custom_call.1
= control target key start
LH: loop header
LB: loop body
LE: loop exit
PB: predicated region body
PF: predicated region fallthrough
CT: control target
= control target key end

     0   :  { %s2658_s0 = inlined_call_operand.hbm [shape: f32[2,8,64], index: 0, kind: input, shape index: {}]   ;;  %s2659_s1 = inlined_call_operand.hbm [shape: bf16[64,192], index: 1, kind: input, shape index: {}]   ;;  %s2660_s2 = inlined_call_operand.vmem [shape: f32[1,192], index: 2, kind: input, shape index: {}]   ;;  %s2661_s3 = inlined_call_operand.hbm [shape: bf16[64,64], index: 3, kind: input, shape index: {}]   ;;  %s2662_s4 = inlined_call_operand.vmem [shape: f32[1,64], index: 4, kind: input, shape index: {}]   ;;  %s2663_s5 = inlined_call_operand.vmem [shape: f32[1,64], index: 5, kind: input, shape index: {}]   ;;  %s2664_s6 = inlined_call_operand.vmem [shape: f32[1,64], index: 6, kind: input, shape index: {}]   ;;  %s2665_s7 = inlined_call_operand.vmem [shape: f32[2,1,256], index: 7, kind: input, shape index: {}]   ;;  %s2666_s8 = inlined_call_operand.hbm [shape: bf16[256,128], index: 8, kind: input, shape index: {}]   ;;  %s2667_s9 = inlined_call_operand.vmem [shape: f32[1,128], index: 9, kind: input, shape index: {}]   ;;  %s2668_s10 = inlined_call_operand.hbm [shape: f32[2,8,64], index: 10, kind: output, shape index: {0}]   ;;  %s2669_s11 = inlined_call_operand.hbm [shape: f32[2,1,128], index: 11, kind: output, shape index: {1}]  }
   0x1   :  { %2677 = sst [smem:[#allocation21_spill]] %s2659_s1 }
   0x2   :  { %2678 = sst [smem:[#allocation22_spill]] %s2661_s3 }
   0x3   :  { %2679 = sst [smem:[#allocation23_spill]] %s2666_s8 }
   0x4   :  { %17 = vsyncpa [#allocation3], 0 }
   0x5   :  { %19 = vsyncpa [#allocation3 + $0x1], 0 }
   0x6   :  { %20 = vsyncpa [#allocation6], 0 }
   0x7   :  { %21 = vsyncpa [#allocation9], 0 }
   0x8   :  { %22 = vsyncpa [#allocation4], 0 }
   0x9   :  { %24 = vsyncpa [#allocation4 + $0x1], 0 }
   0xa   :  { %25 = vsyncpa [#allocation12], 0 }
   0xb   :  { %27 = vsyncpa [#allocation12 + $0x1], 0  ;;  %s2336_s17 = smov 0   ;;  %s2338_s18 = smov 0  }
   0xc   :  { %s2340_s19 = smov 0   ;;  %s2342_s20 = smov 0  }
   0xd LB: > { %2680 = sst [smem:[#allocation18_spill]] %s2250_s19  ;;  %s2357_s21 = sadd.s32 4294967295, %s2254_s20   ;;  %s2254_s20 = sphi %s2342_s20, %s2702_s20   ;;  %s2250_s19 = sphi %s2340_s19, %s2704_s19   ;;  %s2246_s18 = sphi %s2338_s18, %s2706_s18   ;;  %s2242_s17 = sphi %s2336_s17, %s2705_s17  }
   0xe   : > { %s1735_s22 = sadd.s32 4294967294, %s2254_s20   ;;  %p53_p0 = scmp.ne.s32.totalorder %s2246_s18, %s2242_s17 }
   0xf   : > { %p2670_p1 = scmp.eq.s32.totalorder %s2357_s21, 0  ;;  %p277_p3 = scmp.eq.s32.totalorder %s1735_s22, 1 }
  0x10   : > { %p1736_p5 = scmp.ge.s32.totalorder %s2254_s20, 1  ;;  %p310_p7 = scmp.lt.s32.totalorder %s2254_s20, 3 }
  0x11   : > { %p2366_p4 = por %p2670_p1, %p53_p0  ;;  %p2371_p6 = por %p277_p3, %p53_p0 }
  0x12   : > { %p2376_p8 = pnand %p1736_p5, %p310_p7  ;;  %s2256_s26 = smov [#allocation5]  }
  0x13   : > { %s2681_s23 = scalar_select %p2366_p4, 1, 0 }
  0x14   : > { %s2682_s24 = scalar_select %p2371_p6, 1, 0 }
  0x15   : > { %s2683_s25 = scalar_select %p2376_p8, 1, 0 }
  0x16   : > { %s322_s27 = sshll.u32 %s2256_s26, 4  ;;  %p1914_p9 = pneg %p2376_p8  ;;  %s323_s27 = int_to_ptr.vmem [resolvable:$true] %s322_s27 }
  0x17   : > { %s2257_s29 = smov [#allocation7]   ;;  %s2057_s12 = scalar_lea.vmem %s323_s27, 1024 }
  0x18   : > { %p2385_p11 = pnand %p1914_p9, %p2670_p1  ;;  %s338_s30 = sshll.u32 %s2257_s29, 4  ;;  %s339_s30 = int_to_ptr.vmem [resolvable:$true] %s338_s30 }
  0x19   : > { %p2058_p13 = scmp.ne.s32.totalorder %s323_s27, %s2057_s12  ;;  %p2065_p5 = scmp.lt.s32.totalorder %s323_s27, %s323_s27 }
  0x1a   : > { %p2048_p12 = pneg %p2385_p11  ;;  %p2066_p7 = scmp.lt.s32.totalorder %s2057_s12, %s2057_s12 }
  0x1c   : > { %p2060_p0 = pnand %p2058_p13, %p2048_p12  ;;  %p2067_p10 = por %p2066_p7, %p2065_p5 }
  0x1e   : > { %p2061_p3 = pneg %p2060_p0 }
  0x20   : > { %p2068_p9 = pnand %p2067_p10, %p2061_p3 }
  0x22   : > { %2071 = shalt.err (!%p2068_p9)
}
  0x23   : > { %s2258_s13 = smov 128   ;;  %s2259_s14 = smov 8  }
  0x24   : > { %s2685_s1 = sld [smem:[#allocation21_spill]]  ;;  %s2083_s22 = scalar_lea.vmem %s339_s30, 512 }
  0x25   : > { %p2084_p1 = scmp.ne.s32.totalorder %s339_s30, %s2083_s22  ;;  %p2091_p2 = scmp.lt.s32.totalorder %s339_s30, %s339_s30 }
  0x26   : > { %p2092_p6 = scmp.lt.s32.totalorder %s2083_s22, %s2083_s22 }
  0x27   : > { %p2086_p13 = pnand %p2084_p1, %p2048_p12 }
  0x28   : > { %p2093_p5 = por %p2092_p6, %p2091_p2 }
  0x29   : > { %p2087_p0 = pneg %p2086_p13 }
  0x2a   : > { %1917 = dma.hbm_to_vmem [thread:$0]  (!%p2385_p11), %s2685_s1, 1024, %s323_s27, [#allocation6], %s2258_s13, %s2258_s13, %s2259_s14  }
  0x2b   : > { %p2094_p10 = pnand %p2093_p5, %p2087_p0 }
  0x2d   : > { %2097 = shalt.err (!%p2094_p10)
}
  0x2e   : > { %s2260_s26 = smov 64   ;;  %s2261_s29 = smov 4  }
  0x2f   : > { %s2686_s3 = sld [smem:[#allocation22_spill]]  ;;  %s2262_s27 = smov [#allocation8]  }
  0x30   : > { %s360_s13 = sshll.u32 %s2262_s27, 4  ;;  %s2408_s14 = sadd.s32 1, %s2254_s20   ;;  %s361_s13 = int_to_ptr.vmem [resolvable:$true] %s360_s13 }
  0x31   : > { %2687 = sst [smem:[#allocation19_spill]] %s2408_s14  ;;  %s2109_s16 = scalar_lea.vmem %s361_s13, 2048 }
  0x32   : > { %p2110_p1 = scmp.ne.s32.totalorder %s361_s13, %s2109_s16  ;;  %p2117_p3 = scmp.lt.s32.totalorder %s361_s13, %s361_s13 }
  0x33   : > { %p2118_p7 = scmp.lt.s32.totalorder %s2109_s16, %s2109_s16 }
  0x34   : > { %p2112_p2 = pnand %p2110_p1, %p2048_p12 }
  0x35   : > { %1920 = dma.hbm_to_vmem [thread:$0]  (!%p2385_p11), %s2686_s3, 512, %s339_s30, [#allocation6], %s2260_s26, %s2260_s26, %s2261_s29  }
  0x36   : > { %p2113_p6 = pneg %p2112_p2  ;;  %p2119_p9 = por %p2118_p7, %p2117_p3 }
  0x38   : > { %p2120_p13 = pnand %p2119_p9, %p2113_p6 }
  0x3a   : > { %2123 = shalt.err (!%p2120_p13)
}
  0x3b   : > { %s2688_s8 = sld [smem:[#allocation23_spill]]  ;;  %s37_s12 = ssub.s32 %s2254_s20, %s2408_s14 }
  0x3c   : > { %s40_s15 = sadd.s32 1, %s2250_s19  ;;  %p38_p12 = scmp.eq.s32.totalorder %s37_s12, 0 }
  0x3d   : > { %p47_p0 = scmp.ne.s32.totalorder %s2250_s19, %s2246_s18  ;;  %p48_p5 = scmp.eq.s32.totalorder %s2254_s20, 0 }
  0x3e   : > { %p1938_p10 = scmp.lt.s32.totalorder %s2254_s20, 2  ;;  %p2690_p2 = scmp.eq.s32.totalorder %s2357_s21, 1 }
  0x3f   : > { %s2426_s28 = scalar_select %p38_p12, %s2250_s19, %s40_s15  }
  0x40   : > { %p49_p1 = por %p48_p5, %p47_p0  ;;  %p2430_p6 = por %p2690_p2, %p47_p0 }
  0x41   : > { %1923 = dma.hbm_to_vmem [thread:$0]  (!%p2385_p11), %s2688_s8, 2048, %s361_s13, [#allocation9], %s2260_s26, %s2260_s26, %s2261_s29  }
  0x42   : > { %2689 = sst [smem:[#allocation20_spill]] %s2426_s28  ;;  %s377_s16 = sand.u32 1, %s2250_s19  }
  0x43   : > { %s2691_s27 = scalar_select %p2430_p6, 1, 0 }
  0x44   : > { %s1742_s22 = sshll.u32 %s2254_s20, 7  ;;  %s1741_s30 = sshll.u32 %s377_s16, 3 }
  0x45   : > { %s2439_s26 = scalar_lea.hbm %s2658_s0, %s1742_s22  ;;  %s381_s29 = scalar_lea.vmem [#allocation2], %s1741_s30 }
  0x46   : > { %s388_s13 = sshll.u32 %s381_s29, 4  ;;  %p2441_p11 = pnand %p1938_p10, %p49_p1  ;;  %s389_s13 = int_to_ptr.vmem [resolvable:$true] %s388_s13 }
  0x47   : > { %s378_s15 = scalar_lea.sflag [#allocation3], %s377_s16  ;;  %s2124_s8 = scalar_lea.hbm %s2439_s26, 128 }
  0x48   : > { %p2125_p3 = scmp.ne.s32.totalorder %s2439_s26, %s2124_s8  ;;  %p2126_p7 = pneg %p2441_p11 }
  0x49   : > { %s2129_s22 = scalar_lea.hbm %s2658_s0, 256  ;;  %p2130_p12 = scmp.lt.s32.totalorder %s2439_s26, %s2658_s0 }
  0x4a   : > { %p2127_p9 = pnand %p2126_p7, %p2125_p3  ;;  %p2131_p0 = scmp.lt.s32.totalorder %s2129_s22, %s2124_s8 }
  0x4c   : > { %p2128_p13 = pneg %p2127_p9  ;;  %p2132_p5 = por %p2131_p0, %p2130_p12 }
  0x4e   : > { %p2133_p10 = pnand %p2132_p5, %p2128_p13 }
  0x50   : > { %2136 = shalt.err (!%p2133_p10)
}
  0x51   : > { %s2137_s29 = scalar_lea.vmem %s389_s13, 128  ;;  %s2263_s16 = smov [#allocation2]  }
  0x52   : > { %p2138_p1 = scmp.ne.s32.totalorder %s389_s13, %s2137_s29  ;;  %s2142_s19 = sshll.u32 %s2263_s16, 4  ;;  %s2143_s19 = int_to_ptr.vmem [resolvable:$false] %s2142_s19 }
  0x53   : > { %s2144_s14 = scalar_lea.vmem %s2143_s19, 256  ;;  %p2145_p3 = scmp.lt.s32.totalorder %s389_s13, %s2143_s19 }
  0x54   : > { %p2140_p2 = pnand %p2138_p1, %p2126_p7  ;;  %p2146_p9 = scmp.lt.s32.totalorder %s2144_s14, %s2137_s29 }
  0x56   : > { %p2141_p6 = pneg %p2140_p2  ;;  %p2147_p4 = por %p2146_p9, %p2145_p3 }
  0x58   : > { %p2148_p8 = pnand %p2147_p4, %p2141_p6 }
  0x5a   : > { %2151 = shalt.err (!%p2148_p8)
}
  0x5b   : > { %1927 = dma.hbm_to_vmem [thread:$0]  (!%p2441_p11), %s2439_s26, 128, %s389_s13, %s378_s15  }
  0x5c   : > { %p2693_p13 = scmp.ne.s32.totalorder %s2683_s25, 0 }
  0x5d   : > { %s2462_s8 = sand.u32 (!%p2693_p13), 1, %s2246_s18   ;;  %p2694_p4 = scmp.ne.s32.totalorder (!%p2693_p13), %s2681_s23, 0 }
  0x5e   : > { %404 = sbr.rel (%p2693_p13) target bundleno = 3298 (0xce2), region = 60  ;;  %s1744_s28 = sshll.u32 (!%p2693_p13), %s2462_s8, 3 }
  0x5f   : > { %s407_s19 = scalar_lea.sflag (!%p2693_p13), [#allocation3], %s2462_s8  ;;  %s410_s14 = scalar_lea.vmem (!%p2693_p13), [#allocation2], %s1744_s28 }
  0x63   : > { %2221 = dma.done.wait (%p2694_p4), %s407_s19, 128  }
  0x64   : > { %2223 = vsyncadd (%p2694_p4), %s407_s19, 4294967168  ;;  %p2695_p8 = scmp.eq.s32.totalorder %s2357_s21, 0 }
  0x66   : > { %2225 = dma.done.wait (%p2695_p8), [#allocation6], 1536   ;;  %p2696_p6 = pmov %p2695_p8 }
  0x68   : > { %2227 = vsyncadd (%p2696_p6), [#allocation6], 4294965760  ;;  %p2697_p11 = pmov %p2696_p6 }
  0x69   : > { %p2698_p7 = pmov %p2696_p6 }
  0x6a   : > { %2229 = dma.done.wait (%p2697_p11), [#allocation9], 2048  }
  0x6b   : > { %2231 = vsyncadd (%p2698_p7), [#allocation9], 4294965248  ;;  %v2264_v0 = vmov 0   ;;  %v1992_v1 = vld [vmem:[#allocation5 + $0x34] ss:$8 sps:$4 sm:$0xff]   ;;  %vm536_vm0 = vcmask 523264   ;;  %v486_v12 = vlaneseq }
  0x6c   : > { %572 = vmatprep.mubr.bf16.mxu0 %v2264_v0  ;;  %v1994_v2 = vld [vmem:[#allocation5 + $0x30] ss:$8 sps:$4 sm:$0xff]   ;;  %548 = vmatprep.subr.bf16.mxu0 %v1992_v1  ;;  %v1995_v3 = vld [vmem:[#allocation5 + $0x24] ss:$8 sps:$4 sm:$0xff]   ;;  %v1997_v4 = vld [vmem:[#allocation5 + $0x20] ss:$8 sps:$4 sm:$0xff]  }
  0x6d   : > { %549 = vmatpush1.bf16.msra.mxu0 %v1994_v2  ;;  %v1998_v5 = vld [vmem:[#allocation5 + $0x14] ss:$8 sps:$4 sm:$0xff]   ;;  %v2000_v6 = vld [vmem:[#allocation5 + $0x10] ss:$8 sps:$4 sm:$0xff]   ;;  %v2001_v7 = vld [vmem:[#allocation5 + $0x4] ss:$8 sps:$4 sm:$0xff]  }
  0x6e   : > { %550 = vmatprep.subr.bf16.mxu0 %v1995_v3  ;;  %v2003_v8 = vld [vmem:[#allocation5] ss:$8 sps:$4 sm:$0xff]   ;;  %v2480_v9 = vld [vmem:[%s410_s14] sm:$0xff]  ;;  %v2265_v11 = vmov 0.0   ;;  %v2486_v13 = vshrl.u32 %v486_v12, 7  ;;  %vm2266_vm1 = vmmov 0  }
  0x6f   : > { %v475_v10 = vpack.c.bf16 %v2480_v9, %v2480_v9  ;;  %1844 = vmatprep.subr.mxu1 %v2265_v11  ;;  %1846 = vmatprep.mubr.msk.f32.mxu1 %vm2266_vm1, %v2265_v11  ;;  %v484_v15 = vld [vmem:[%s2660_s2] sm:$0x3]  ;;  %s2267_s26 = smov 48   ;;  %s2268_s13 = smov 64   ;;  %vm585_vm2 = vcmask 130048   ;;  %vm661_vm3 = vcmask 64512  }
  0x70   : > { %v488_v14 = vsub.s32 0, %v2486_v13  ;;  %v492_v22 = vsub.s32 1, %v2486_v13  ;;  %s2269_s12 = smov 112   ;;  %s2270_s15 = smov 96   ;;  %vm1255_vm4 = vcmask 261120   ;;  %vm1257_vm5 = vcmask 392192  }
  0x71   : > { %551 = vmatpush1.bf16.msra.mxu0 %v1997_v4  ;;  %s2271_s1 = smov 32   ;;  %s2272_s3 = smov 80  }
  0x72   : > { %552 = vmatprep.subr.bf16.mxu0 %v1998_v5  ;;  %v489_v16 = vrot.slane %v484_v15, %v488_v14  ;;  %v493_v23 = vrot.slane %v484_v15, %v492_v22  ;;  %s2273_s22 = smov 16   ;;  %p469_p12 = scmp.lt.s32.totalorder %s2357_s21, 1 }
  0x73   : > { %p2699_p5 = scmp.ne.s32.totalorder %s2691_s27, 0  ;;  %s2274_s19 = smov [#allocation11]  }
  0x74   : > { %s470_s30 = scalar_select %p469_p12, %s2357_s21, 1 }
  0x75   : > { %553 = vmatpush1.bf16.msra.mxu0 %v2000_v6 }
  0x76   : > { %554 = vmatprep.subr.bf16.mxu0 %v2001_v7  ;;  %s1749_s29 = sshll.u32 %s470_s30, 1 }
  0x77   : > { %s472_s14 = scalar_lea.vmem %s2665_s7, %s1749_s29  ;;  %s1571_s29 = scalar_lea.sflag [#allocation12], %s2462_s8 }
  0x79   : > { %555 = vmatpush1.bf16.msra.mxu0 %v2003_v8 }
  0x7c   : > { %1758 = vmatmul.mubr.msk.bf16.vlgmr.msra.gmra.mxu0 %vm536_vm0, %v475_v10 }
 0x13c   : > { %v574_v17 = vpop.f32.mrf.mxu0 }
 0x13d   : > { %v2496_v18 = vadd.f32 %v574_v17, %v489_v16 }
 0x13e   : > { %v576_v19 = vpop.f32.mrf.mxu0 }
 0x13f   : > { %748 = vrot.lane.b32.xlu1 %v2496_v18, %s2267_s26  ;;  %583 = vrot.lane.b32.xlu0 %v2496_v18, %s2268_s13  ;;  %v2506_v25 = vmul.f32 0.25, %v2496_v18  ;;  %v2509_v26 = vadd.f32 %v576_v19, %v493_v23 }
 0x140   : > { %v578_v20 = vpop.f32.mrf.mxu0 }
 0x142   : > { %v579_v21 = vpop.f32.mrf.mxu0 }
 0x1b1   : > { %v584_v24 = vpop.permute.xlu0 %583  ;;  %v749_v35 = vpop.permute.xlu1 %748 }
 0x1b2   : > { %1845 = vmatpush3.xpose.msk.msra.mxu1 %vm585_vm2, %v584_v24 }
 0x1b3   : > { %1849 = vmatprep.subr.mxu1 %v2265_v11 }
 0x1b5   : > { %1847 = vmatmul.mubr.msk.f32.vlgmr.msra.gmra.mxu1 %vm585_vm2, %v2506_v25 }
 0x1b6   : > { %1850 = vmatpush3.msra.mxu1 %v2509_v26  ;;  %1851 = vmatprep.mubr.msk.f32.mxu1 %vm2266_vm1, %v2265_v11 }
 0x1b7   : > { %1854 = vmatprep.subr.mxu1 %v2265_v11 }
 0x275   : > { %v657_v27 = vpop.f32.mrf.mxu1 }
 0x276   : > { %v662_v28 = vsel %vm661_vm3, %v657_v27, -inf }
 0x277   : > { %663 = vmax.xlane.f32.xlu0 %v662_v28  ;;  %v1848_v29 = vpop.f32.mrf.mxu1  ;;  %v2005_v28 = vld [vmem:[#allocation7 + $0x10] sm:$0xff]  }
 0x278   : > { %v2006_v29 = vld [vmem:[#allocation7 + $0x8] sm:$0xff]  }
 0x28d   : > { %836 = vrot.lane.b32.xlu0 %v2509_v26, %s2269_s12 }
 0x300   : > { %v664_v30 = vpop.xlane.xlu0 %663 }
 0x301   : > { %v665_v31 = vsub.f32 %v657_v27, %v664_v30  ;;  %v2004_v27 = vld [vmem:[#allocation7 + $0x18] sm:$0xff]   ;;  %v2007_v30 = vld [vmem:[#allocation7] sm:$0xff]  }
 0x303   : > { %v666_v32 = vmul.f32 1.442695, %v665_v31 }
 0x304   : > { %v837_v40 = vpop.permute.xlu0 %836 }
 0x305   : > { %2024 = vpow2.f32 %v666_v32 }
 0x312   : > { %v2025_v33 = vpop.eup %2024 }
 0x313   : > { %v668_v34 = vsel %vm661_vm3, %v2025_v33, 0.0 }
 0x314   : > { %669 = vadd.xlane.f32.xlu1 %v668_v34 }
 0x325   : > { %746 = vrot.lane.b32.xlu1 %v2506_v25, %s2269_s12  ;;  %s468_s12 = scalar_lea.vmem [#allocation11], %s2462_s8 }
 0x39d   : > { %v670_v36 = vpop.xlane.xlu1 %669 }
 0x39e   : > { %2026 = vrcp.f32 %v670_v36 }
 0x3a1   : > { %v747_v39 = vpop.permute.xlu1 %746 }
 0x3ab   : > { %v2027_v37 = vpop.eup %2026 }
 0x3ac   : > { %v672_v38 = vmul.f32 %v2027_v37, %v2025_v33 }
 0x3ae   : > { %1852 = vmatmul.mubr.msk.f32.vlgmr.msra.gmra.mxu1 %vm661_vm3, %v672_v38 }
 0x3af   : > { %1855 = vmatpush3.xpose.msk.msra.mxu1 %vm585_vm2, %v749_v35  ;;  %1856 = vmatprep.mubr.msk.f32.mxu1 %vm2266_vm1, %v2265_v11 }
 0x3b0   : > { %1859 = vmatprep.subr.mxu1 %v2265_v11 }
 0x3b2   : > { %1857 = vmatmul.mubr.msk.f32.vlgmr.msra.gmra.mxu1 %vm585_vm2, %v747_v39 }
 0x3b3   : > { %1860 = vmatpush3.msra.mxu1 %v837_v40  ;;  %1861 = vmatprep.mubr.msk.f32.mxu1 %vm2266_vm1, %v2265_v11 }
 0x3b4   : > { %1864 = vmatprep.subr.mxu1 %v2265_v11 }
 0x46e   : > { %v2530_v41 = vpop.f32.mrf.mxu1 }
 0x470   : > { %v1853_v42 = vpop.f32.mrf.mxu1 }
 0x472   : > { %v820_v43 = vpop.f32.mrf.mxu1 }
 0x473   : > { %v824_v44 = vsel %vm661_vm3, %v820_v43, -inf }
 0x474   : > { %825 = vmax.xlane.f32.xlu1 %v824_v44  ;;  %v1858_v45 = vpop.f32.mrf.mxu1 }
 0x475   : > { %v2008_v45 = vld [vmem:[#allocation8 + $0x78] sm:$0xff]  }
 0x476   : > { %1822 = vmatprep.subr.bf16.mxu0 %v2008_v45 }
 0x485   : > { %912 = vrot.lane.b32.xlu1 %v2506_v25, %s2270_s15 }
 0x4fd   : > { %v826_v46 = vpop.xlane.xlu1 %825 }
 0x4fe   : > { %v827_v47 = vsub.f32 %v820_v43, %v826_v46  ;;  %v2009_v46 = vld [vmem:[#allocation8 + $0x38] sm:$0xff]  }
 0x4ff   : > { %1823 = vmatpush3.bf16.msra.mxu0 %v2009_v46 }
 0x500   : > { %v828_v48 = vmul.f32 1.442695, %v827_v47  ;;  %v2010_v47 = vld [vmem:[#allocation8 + $0x70] sm:$0xff]  }
 0x501   : > { %v913_v55 = vpop.permute.xlu1 %912  ;;  %1824 = vmatprep.subr.bf16.mxu0 %v2010_v47 }
 0x502   : > { %2028 = vpow2.f32 %v828_v48 }
 0x50f   : > { %v2029_v49 = vpop.eup %2028 }
 0x510   : > { %v830_v50 = vsel %vm661_vm3, %v2029_v49, 0.0 }
 0x511   : > { %831 = vadd.xlane.f32.xlu0 %v830_v50  ;;  %v2011_v50 = vld [vmem:[#allocation8 + $0x30] sm:$0xff]  }
 0x512   : > { %1825 = vmatpush3.bf16.msra.mxu0 %v2011_v50 }
 0x527   : > { %914 = vrot.lane.b32.xlu0 %v2496_v18, %s2271_s1 }
 0x59a   : > { %v832_v51 = vpop.xlane.xlu0 %831 }
 0x59b   : > { %2030 = vrcp.f32 %v832_v51  ;;  %v2012_v51 = vld [vmem:[#allocation8 + $0x68] sm:$0xff]  }
 0x59c   : > { %1826 = vmatprep.subr.bf16.mxu0 %v2012_v51 }
 0x59e   : > { %v915_v54 = vpop.permute.xlu0 %914 }
 0x5a8   : > { %v2031_v52 = vpop.eup %2030 }
 0x5a9   : > { %v834_v53 = vmul.f32 %v2031_v52, %v2029_v49  ;;  %v2013_v52 = vld [vmem:[#allocation8 + $0x28] sm:$0xff]  }
 0x5aa   : > { %1827 = vmatpush3.bf16.msra.mxu0 %v2013_v52 }
 0x5ab   : > { %1862 = vmatmul.mubr.msk.f32.vlgmr.msra.gmra.mxu1 %vm661_vm3, %v834_v53  ;;  %v2014_v53 = vld [vmem:[#allocation8 + $0x60] sm:$0xff]  }
 0x5ac   : > { %1865 = vmatpush3.xpose.msk.msra.mxu1 %vm585_vm2, %v915_v54  ;;  %1866 = vmatprep.mubr.msk.f32.mxu1 %vm2266_vm1, %v2265_v11  ;;  %v2015_v54 = vld [vmem:[#allocation8 + $0x20] sm:$0xff]  }
 0x5ad   : > { %1869 = vmatprep.subr.mxu1 %v2265_v11  ;;  %1828 = vmatprep.subr.bf16.mxu0 %v2014_v53 }
 0x5ae   : > { %1829 = vmatpush3.bf16.msra.mxu0 %v2015_v54 }
 0x5af   : > { %1867 = vmatmul.mubr.msk.f32.vlgmr.msra.gmra.mxu1 %vm585_vm2, %v913_v55  ;;  %v2016_v55 = vld [vmem:[#allocation8 + $0x58] sm:$0xff]  }
 0x5b0   : > { %1871 = vmatprep.mubr.msk.f32.mxu1 %vm2266_vm1, %v2265_v11  ;;  %1830 = vmatprep.subr.bf16.mxu0 %v2016_v55 }
 0x66b   : > { %v908_v56 = vpop.f32.mrf.mxu1 }
 0x66d   : > { %v1863_v57 = vpop.f32.mrf.mxu1 }
 0x66e   : > { %v2018_v57 = vld [vmem:[#allocation8 + $0x50] sm:$0xff]  }
 0x66f   : > { %v986_v58 = vpop.f32.mrf.mxu1 }
 0x670   : > { %v990_v59 = vsel %vm661_vm3, %v986_v58, -inf }
 0x671   : > { %991 = vmax.xlane.f32.xlu0 %v990_v59  ;;  %v1868_v60 = vpop.f32.mrf.mxu1  ;;  %v2021_v59 = vld [vmem:[#allocation8 + $0x8] sm:$0xff]  }
 0x672   : > { %v2022_v60 = vld [vmem:[#allocation8 + $0x40] sm:$0xff]  }
 0x687   : > { %1001 = vrot.lane.b32.xlu0 %v2509_v26, %s2270_s15  ;;  %s1798_s15 = sshll.u32 %s2357_s21, 4 }
 0x688   : > { %s1594_s30 = scalar_lea.hbm %s2669_s11, %s1798_s15 }
 0x68b   : > { %1077 = vrot.lane.b32.xlu0 %v2506_v25, %s2272_s3 }
 0x6fa   : > { %v992_v61 = vpop.xlane.xlu0 %991 }
 0x6fb   : > { %v993_v62 = vsub.f32 %v986_v58, %v992_v61  ;;  %v2020_v58 = vld [vmem:[#allocation8 + $0x48] sm:$0xff]  }
 0x6fd   : > { %v994_v63 = vmul.f32 1.442695, %v993_v62  ;;  %v2023_v62 = vld [vmem:[#allocation8] sm:$0xff]  }
 0x6fe   : > { %v1002_v0 = vpop.permute.xlu0 %1001 }
 0x6ff   : > { %2032 = vpow2.f32 %v994_v63  ;;  %1870 = vmatpush3.msra.mxu1 %v1002_v0  ;;  %v1771_v0 = vld [vmem:[%s2662_s4] ss:$0 sm:$0xff] }
 0x700   : > { %1874 = vmatprep.subr.mxu1 %v2265_v11 }
 0x702   : > { %v1078_v7 = vpop.permute.xlu0 %1077 }
 0x70c   : > { %v2033_v1 = vpop.eup %2032 }
 0x70d   : > { %v996_v2 = vsel %vm661_vm3, %v2033_v1, 0.0 }
 0x70e   : > { %997 = vadd.xlane.f32.xlu1 %v996_v2 }
 0x71f   : > { %1079 = vrot.lane.b32.xlu1 %v2496_v18, %s2273_s22 }
 0x797   : > { %v998_v3 = vpop.xlane.xlu1 %997 }
 0x798   : > { %2034 = vrcp.f32 %v998_v3 }
 0x79b   : > { %v1080_v6 = vpop.permute.xlu1 %1079 }
 0x7a5   : > { %v2035_v4 = vpop.eup %2034 }
 0x7a6   : > { %v1000_v5 = vmul.f32 %v2035_v4, %v2033_v1 }
 0x7a8   : > { %1872 = vmatmul.mubr.msk.f32.vlgmr.msra.gmra.mxu1 %vm661_vm3, %v1000_v5 }
 0x7a9   : > { %1875 = vmatpush3.xpose.msk.msra.mxu1 %vm585_vm2, %v1080_v6  ;;  %1876 = vmatprep.mubr.msk.f32.mxu1 %vm2266_vm1, %v2265_v11 }
 0x7aa   : > { %1879 = vmatprep.subr.mxu1 %v2265_v11 }
 0x7ac   : > { %1877 = vmatmul.mubr.msk.f32.vlgmr.msra.gmra.mxu1 %vm585_vm2, %v1078_v7 }
 0x7ad   : > { %1881 = vmatprep.mubr.msk.f32.mxu1 %vm2266_vm1, %v2265_v11 }
 0x868   : > { %v1073_v8 = vpop.f32.mrf.mxu1 }
 0x86a   : > { %v1873_v10 = vpop.f32.mrf.mxu1 }
 0x86c   : > { %v1151_v12 = vpop.f32.mrf.mxu1 }
 0x86d   : > { %v1155_v15 = vsel %vm661_vm3, %v1151_v12, -inf }
 0x86e   : > { %1156 = vmax.xlane.f32.xlu0 %v1155_v15  ;;  %v1878_v16 = vpop.f32.mrf.mxu1 }
 0x884   : > { %1166 = vrot.lane.b32.xlu0 %v2509_v26, %s2272_s3 }
 0x888   : > { %1247 = vrot.lane.b32.xlu0 %v1073_v8, %s2271_s1  ;;  %s1596_s1 = sshll.u32 %s468_s12, 4  ;;  %s1597_s1 = int_to_ptr.vmem [resolvable:$true] %s1596_s1 }
 0x889   : > { %s2152_s16 = scalar_lea.vmem %s1597_s1, 16 }
 0x88a   : > { %p2153_p0 = scmp.ne.s32.totalorder %s1597_s1, %s2152_s16 }
 0x88c   : > { %p2154_p10 = pnand %p2153_p0, %p2699_p5 }
 0x88e   : > { %p2155_p1 = pneg %p2154_p10 }
 0x8f7   : > { %v1157_v17 = vpop.xlane.xlu0 %1156 }
 0x8f8   : > { %v1158_v18 = vsub.f32 %v1151_v12, %v1157_v17 }
 0x8fa   : > { %v1159_v19 = vmul.f32 1.442695, %v1158_v18 }
 0x8fb   : > { %v1167_v20 = vpop.permute.xlu0 %1166 }
 0x8fc   : > { %2036 = vpow2.f32 %v1159_v19  ;;  %1880 = vmatpush3.msra.mxu1 %v1167_v20 }
 0x8fd   : > { %1884 = vmatprep.subr.bf16.mxu1 %v2265_v11 }
 0x8ff   : > { %v1248_v34 = vpop.permute.xlu0 %1247 }
 0x909   : > { %v2037_v21 = vpop.eup %2036 }
 0x90a   : > { %v1161_v23 = vsel %vm661_vm3, %v2037_v21, 0.0 }
 0x90b   : > { %1162 = vadd.xlane.f32.xlu1 %v1161_v23 }
 0x91c   : > { %1243 = vrot.lane.b32.xlu1 %v908_v56, %s2273_s22  ;;  %v2017_v56 = vld [vmem:[#allocation8 + $0x18] sm:$0xff]  }
 0x91d   : > { %1831 = vmatpush3.bf16.msra.mxu0 %v2017_v56 }
 0x91e   : > { %1832 = vmatprep.subr.bf16.mxu0 %v2018_v57 }
 0x994   : > { %v1163_v24 = vpop.xlane.xlu1 %1162 }
 0x995   : > { %2038 = vrcp.f32 %v1163_v24 }
 0x998   : > { %v1244_v33 = vpop.permute.xlu1 %1243 }
 0x999   : > { %v1254_v35 = vsel %vm585_vm2, %v2530_v41, %v1244_v33 }
 0x99a   : > { %v1256_v36 = vsel %vm1255_vm4, %v1254_v35, %v1248_v34 }
 0x9a2   : > { %v2039_v25 = vpop.eup %2038 }
 0x9a3   : > { %v1165_v26 = vmul.f32 %v2039_v25, %v2037_v21 }
 0x9a5   : > { %1882 = vmatmul.mubr.msk.f32.vlgmr.msra.gmra.mxu1 %vm661_vm3, %v1165_v26 }
 0x9a6   : > { %1892 = vmatprep.mubr.msk.bf16.mxu1 %vm2266_vm1, %v2265_v11  ;;  %1885 = vmatpush3.bf16.msra.mxu1 %v2004_v27 }
 0x9a7   : > { %1886 = vmatprep.subr.bf16.mxu1 %v2265_v11 }
 0x9aa   : > { %1887 = vmatpush3.bf16.msra.mxu1 %v2005_v28 }
 0x9ab   : > { %1888 = vmatprep.subr.bf16.mxu1 %v2265_v11 }
 0x9ae   : > { %1889 = vmatpush3.bf16.msra.mxu1 %v2006_v29 }
 0x9af   : > { %1890 = vmatprep.subr.bf16.mxu1 %v2265_v11  ;;  %v1374_v11 = vld [vmem:[%s472_s14] sm:$0x3]  ;;  %s2156_s14 = sshll.u32 %s2274_s19, 4  ;;  %s2157_s14 = int_to_ptr.vmem [resolvable:$false] %s2156_s14 }
 0x9b0   : > { %v1779_v40 = vmul.f32 -1.442695, %v1374_v11  ;;  %s2158_s23 = scalar_lea.vmem %s2157_s14, 32  ;;  %p2159_p2 = scmp.lt.s32.totalorder %s1597_s1, %s2157_s14 }
 0x9b1   : > { %p2160_p3 = scmp.lt.s32.totalorder %s2158_s23, %s2152_s16 }
 0x9b2   : > { %1891 = vmatpush3.bf16.msra.mxu1 %v2007_v30  ;;  %2040 = vpow2.f32 %v1779_v40 }
 0x9b3   : > { %p2161_p9 = por %p2160_p3, %p2159_p2 }
 0x9b5   : > { %p2162_p13 = pnand %p2161_p9, %p2155_p1 }
 0x9bf   : > { %v2041_v42 = vpop.eup %2040 }
 0x9c0   : > { %v1378_v41 = vadd.f32 1.0, %v2041_v42 }
 0x9c2   : > { %2042 = vrcp.f32 %v1378_v41 }
 0x9cf   : > { %v2043_v43 = vpop.eup %2042 }
 0x9d0   : > { %v1381_v44 = vmul.f32 %v2043_v43, %v1374_v11 }
 0x9d2   : > { %v1390_v48 = vrot.slane %v1381_v44, %v492_v22  ;;  %v2019_v22 = vld [vmem:[#allocation8 + $0x10] sm:$0xff]   ;;  %v1386_v61 = vrot.slane %v1381_v44, %v488_v14 }
 0x9d3   : > { %1833 = vmatpush3.bf16.msra.mxu0 %v2019_v22 }
 0x9d4   : > { %v1394_v49 = vpack.c.bf16 %v1390_v48, %v1390_v48  ;;  %1834 = vmatprep.subr.bf16.mxu0 %v2020_v58  ;;  %v1393_v63 = vpack.c.bf16 %v1386_v61, %v1386_v61 }
 0x9d6   : > { %1556 = vmatprep.mubr.bf16.mxu0 %v1394_v49 }
 0x9d7   : > { %1835 = vmatpush3.bf16.msra.mxu0 %v2021_v59 }
 0x9d8   : > { %1836 = vmatprep.subr.bf16.mxu0 %v2022_v60 }
 0x9db   : > { %1837 = vmatpush3.bf16.msra.mxu0 %v2023_v62 }
 0x9de   : > { %1557 = vmatmul.mubr.bf16.vlgmr.msra.gmra.mxu0 %v1393_v63 }
 0xa65   : > { %v1238_v31 = vpop.f32.mrf.mxu1 }
 0xa66   : > { %1251 = vrot.lane.b32.xlu0 %v1238_v31, %s2267_s26 }
 0xa67   : > { %v1883_v32 = vpop.f32.mrf.mxu1 }
 0xa9e   : > { %v1838_v15 = vpop.f32.mrf.mxu0 }
 0xaa0   : > { %v1839_v16 = vpop.f32.mrf.mxu0 }
 0xaa1   : > { %v1840_v18 = vadd.f32 %v1839_v16, %v1838_v15 }
 0xaa2   : > { %v1841_v17 = vpop.f32.mrf.mxu0 }
 0xaa4   : > { %v1842_v19 = vpop.f32.mrf.mxu0 }
 0xad8   : > { %v1252_v37 = vpop.permute.xlu0 %1251 }
 0xad9   : > { %v1258_v38 = vsel %vm1257_vm5, %v1256_v36, %v1252_v37 }
 0xada   : > { %v1259_v39 = vpack.c.bf16 %v1258_v38, %v1258_v38 }
 0xadc   : > { %1893 = vmatmul.mubr.msk.bf16.vlgmr.msra.gmra.mxu1 %vm536_vm0, %v1259_v39 }
 0xb9c   : > { %v1336_v1 = vpop.f32.mrf.mxu1 }
 0xb9d   : > { %v1337_v2 = vadd.f32 %v1771_v0, %v1336_v1 }
 0xb9e   : > { %v1894_v3 = vpop.f32.mrf.mxu1 }
 0xb9f   : > { %v1342_v4 = vadd.f32 %v1337_v2, %v2480_v9  ;;  %v1427_v9 = vld [vmem:[%s2667_s9] sm:$0x1] }
 0xba0   : > { %v1339_v5 = vpop.f32.mrf.mxu1  ;;  %v1559_v20 = vadd.f32 %v1840_v18, %v1427_v9 }
 0xba1   : > { %v1345_v6 = vsel %vm536_vm0, %v1342_v4, 0.0 }
 0xba2   : > { %1346 = vadd.xlane.f32.xlu0 %v1345_v6  ;;  %v1895_v13 = vpop.f32.mrf.mxu1  ;;  %1564 = vst [vmem:[%s468_s12] sm:$0x1] %v1559_v20 }
 0xc2b   : > { %v1347_v14 = vpop.xlane.xlu0 %1346 }
 0xc2c   : > { %v1349_v7 = vmul.f32 0.015625, %v1347_v14 }
 0xc2e   : > { %v1350_v8 = vsub.f32 %v1342_v4, %v1349_v7 }
 0xc30   : > { %v1351_v10 = vmul.f32 %v1350_v8, %v1350_v8 }
 0xc32   : > { %v1352_v12 = vsel %vm536_vm0, %v1351_v10, 0.0 }
 0xc33   : > { %1353 = vadd.xlane.f32.xlu1 %v1352_v12 }
 0xc34   : > { %2165 = shalt.err (!%p2162_p13)
}
 0xc35   : > { %s2166_s25 = scalar_lea.hbm %s1594_s30, 16  ;;  %s2170_s12 = scalar_lea.hbm %s2669_s11, 32 }
 0xc36   : > { %p2167_p4 = scmp.ne.s32.totalorder %s1594_s30, %s2166_s25  ;;  %p2171_p11 = scmp.lt.s32.totalorder %s1594_s30, %s2669_s11 }
 0xc37   : > { %p2172_p7 = scmp.lt.s32.totalorder %s2170_s12, %s2166_s25 }
 0xc38   : > { %p2168_p8 = pnand %p2167_p4, %p2699_p5 }
 0xc39   : > { %p2173_p12 = por %p2172_p7, %p2171_p11 }
 0xc3a   : > { %p2169_p6 = pneg %p2168_p8 }
 0xc3c   : > { %p2174_p0 = pnand %p2173_p12, %p2169_p6 }
 0xc3e   : > { %2177 = shalt.err (!%p2174_p0)
}
 0xc3f   : > { %1911 = dma.vmem_to_hbm [thread:$0]  (%p2699_p5), %s1597_s1, 16, %s1594_s30, %s1571_s29   ;;  %v1777_v26 = vld [vmem:[%s2663_s5] ss:$0 sm:$0xff] }
 0xc40   : > { %v1778_v28 = vld [vmem:[%s2664_s6] ss:$0 sm:$0xff]  ;;  %s1797_s23 = sshll.u32 %s2357_s21, 7  ;;  %s462_s25 = scalar_lea.vmem [#allocation10], %s1744_s28 }
 0xc41   : > { %s1583_s1 = sshll.u32 %s462_s25, 4  ;;  %s1581_s26 = scalar_lea.hbm %s2668_s10, %s1797_s23  ;;  %s1584_s1 = int_to_ptr.vmem [resolvable:$true] %s1583_s1 }
 0xc42   : > { %s1566_s13 = scalar_lea.sflag [#allocation4], %s2462_s8  ;;  %s2178_s12 = scalar_lea.vmem %s1584_s1, 128 }
 0xc43   : > { %p2179_p10 = scmp.ne.s32.totalorder %s1584_s1, %s2178_s12  ;;  %s2275_s15 = smov [#allocation10]  }
 0xc44   : > { %s2182_s21 = sshll.u32 %s2275_s15, 4  ;;  %s2183_s21 = int_to_ptr.vmem [resolvable:$false] %s2182_s21 }
 0xc45   : > { %p2180_p1 = pnand %p2179_p10, %p2699_p5  ;;  %s2184_s28 = scalar_lea.vmem %s2183_s21, 256 }
 0xc46   : > { %p2185_p3 = scmp.lt.s32.totalorder %s1584_s1, %s2183_s21  ;;  %p2186_p9 = scmp.lt.s32.totalorder %s2184_s28, %s2178_s12 }
 0xc47   : > { %p2181_p2 = pneg %p2180_p1 }
 0xc48   : > { %p2187_p13 = por %p2186_p9, %p2185_p3 }
 0xc4a   : > { %p2188_p4 = pnand %p2187_p13, %p2181_p2 }
 0xcbc   : > { %v1354_v21 = vpop.xlane.xlu1 %1353 }
 0xcbd   : > { %v1355_v23 = vmul.f32 0.015625, %v1354_v21 }
 0xcbf   : > { %v1356_v24 = vadd.f32 1e-05, %v1355_v23 }
 0xcc1   : > { %2044 = vrsqrt.f32 %v1356_v24 }
 0xcce   : > { %v2045_v25 = vpop.eup %2044 }
 0xccf   : > { %v1358_v27 = vmul.f32 %v2045_v25, %v1350_v8 }
 0xcd1   : > { %v1365_v29 = vmul.f32 %v1777_v26, %v1358_v27 }
 0xcd3   : > { %v1372_v30 = vadd.f32 %v1778_v28, %v1365_v29 }
 0xcd5   : > { %1373 = vst.msk [vmem:[%s462_s25] sm:$0xff] %vm536_vm0, %v1372_v30 }
 0xcd6   : > { %2191 = shalt.err (!%p2188_p4)
}
 0xcd7   : > { %s2192_s3 = scalar_lea.hbm %s1581_s26, 128  ;;  %s2196_s16 = scalar_lea.hbm %s2668_s10, 256 }
 0xcd8   : > { %p2193_p8 = scmp.ne.s32.totalorder %s1581_s26, %s2192_s3  ;;  %p2197_p7 = scmp.lt.s32.totalorder %s1581_s26, %s2668_s10 }
 0xcd9   : > { %p2198_p12 = scmp.lt.s32.totalorder %s2196_s16, %s2192_s3 }
 0xcda   : > { %p2194_p6 = pnand %p2193_p8, %p2699_p5 }
 0xcdb   : > { %p2199_p0 = por %p2198_p12, %p2197_p7 }
 0xcdc   : > { %p2195_p11 = pneg %p2194_p6 }
 0xcde   : > { %p2200_p10 = pnand %p2199_p0, %p2195_p11 }
 0xce0   : > { %2203 = shalt.err (!%p2200_p10)
}
 0xce1   : > { %1910 = dma.vmem_to_hbm [thread:$0]  (%p2699_p5), %s1584_s1, 128, %s1581_s26, %s1566_s13  }
 0xce2 PF: > { %s1608_s23 = sand.u32 1, %s2242_s17   ;;  %p2700_p1 = scmp.ne.s32.totalorder %s2682_s24, 0 }
 0xce3   : > { %p2701_p2 = scmp.ge.s32.totalorder %s2254_s20, 2  ;;  %s1609_s25 = scalar_lea.sflag [#allocation4], %s1608_s23 }
 0xce5   : > { %p1929_p3 = pnand %p2701_p2, %p2700_p1 }
 0xce7   : > { %p1930_p9 = pneg %p1929_p3 }
 0xce9   : > { %2233 = dma.done.wait (%p1930_p9), %s1609_s25, 128  }
 0xcea   : > { %2235 = vsyncadd (%p1930_p9), %s1609_s25, 4294967168  ;;  %s1618_s30 = scalar_lea.sflag [#allocation12], %s1608_s23 }
 0xceb   : > { %2237 = dma.done.wait (%p1930_p9), %s1618_s30, 16  }
 0xcec   : > { %2239 = vsyncadd (%p1930_p9), %s1618_s30, 4294967280  ;;  %s2702_s20 = sld [smem:[#allocation19_spill]]  ;;  %s2705_s17 = smov %s2246_s18 }
 0xced   : > { %s2703_s29 = sld [smem:[#allocation18_spill]] }
 0xcee   : > { %s2704_s19 = sld [smem:[#allocation20_spill]] }
 0xcf2   : > { %p30_p5 = scmp.ge.s32.totalorder %s2702_s20, 4  }
 0xcf3   : > { %s2706_s18 = smov %s2703_s29 }
 0xcf4   :  { %32 = sbr.rel (!%p30_p5) target bundleno = 13 (0xd), region = 137 }
 0xcf9   :  { %1622 = vsyncpa [#allocation3], 1 }
 0xcfa   :  { %1624 = vsyncpa [#allocation3 + $0x1], 1 }
 0xcfb   :  { %1625 = vsyncpa [#allocation6], 1 }
 0xcfc   :  { %1626 = vsyncpa [#allocation9], 1 }
 0xcfd   :  { %1627 = vsyncpa [#allocation4], 1 }
 0xcfe   :  { %1629 = vsyncpa [#allocation4 + $0x1], 1 }
 0xcff   :  { %1630 = vsyncpa [#allocation12], 1 }
 0xd00   :  { %1632 = vsyncpa [#allocation12 + $0x1], 1 }

</bundles_post_ra>
